<compile_context>
chip_gen: v6e
topology: v6e:2x2x1
jax: 0.10.0
libtpu: 0.0.40
codegen_flags: <defaults>
</compile_context>

<pallas_src>
import functools

import jax
import jax.numpy as jnp
from jax import lax
from jax.experimental import pallas as pl
from jax.experimental.pallas import tpu as pltpu

_INV_SQRT2 = 0.7071067811865476


def _gelu_erf(h):
    # Exact GELU (erf formulation) — matches torch.nn.GELU() default.
    return 0.5 * h * (1.0 + lax.erf(h * jnp.float32(_INV_SQRT2)))


# --------------------- resident-weight path (weights live in VMEM) ----------------------
def _ffn_resident_kernel(x_ref, w1_ref, b1_ref, w2_ref, b2_ref, o_ref):
    # x (tm, dim) bf16 ; W1 (hidden, dim) bf16 ; W2 (dim, hidden) bf16 (PyTorch-native)
    # TODO(synk): verify via pl.lower_as_mlir that the NT-form dot_generals below do not
    # emit a per-step XLU transpose; if they do, pre-transpose the weights once at init.
    h = lax.dot_general(x_ref[...], w1_ref[...], (((1,), (1,)), ((), ())),
                        preferred_element_type=jnp.float32)            # (tm, hidden) f32
    h = _gelu_erf(h + b1_ref[...])
    out = lax.dot_general(h.astype(jnp.bfloat16), w2_ref[...],
                          (((1,), (1,)), ((), ())),
                          preferred_element_type=jnp.float32)           # (tm, dim) f32
    o_ref[...] = (out + b2_ref[...]).astype(o_ref.dtype)


# --------------------- streaming path (hidden reduction, f32 accumulator) ---------------
def _ffn_reduction_kernel(x_ref, w1_ref, b1_ref, w2_ref, b2_ref, o_ref, acc_ref, *, th):
    h_idx = pl.program_id(1)

    @pl.when(h_idx == 0)
    def _():
        acc_ref[...] = jnp.zeros_like(acc_ref)

    # Linear 1 partial: x @ W1[th-slice]^T
    h = lax.dot_general(x_ref[...], w1_ref[...], (((1,), (1,)), ((), ())),
                        preferred_element_type=jnp.float32)             # (tm, th) f32
    start = pl.multiple_of(h_idx * th, th)
    h = _gelu_erf(h + b1_ref[:, pl.ds(start, th)])                      # b1 resident, sliced

    # Linear 2 partial: gelu(h) @ W2[:, th-slice]^T  accumulated in f32
    acc_ref[...] += lax.dot_general(h.astype(jnp.bfloat16), w2_ref[...],
                                    (((1,), (1,)), ((), ())),
                                    preferred_element_type=jnp.float32)  # (tm, dim)

    @pl.when(h_idx == pl.num_programs(1) - 1)
    def _():
        o_ref[...] = (acc_ref[...] + b2_ref[...]).astype(o_ref.dtype)


def _round_up(a, b):
    return ((a + b - 1) // b) * b


def _vmem_budget_bytes():
    try:
        cap = int(pltpu.get_tpu_info().vmem_capacity_bytes)
    except Exception:
        cap = 0
    if cap <= 0:
        cap = 64 * 1024 * 1024   # conservative: v7x per-TensorCore VMEM (smallest gen)
    # Leave headroom for compiler scratch / semaphores / double buffers.
    return (cap * 3) // 4        # ~96 MiB on v5e/v6e, ~48 MiB on v7x


@functools.partial(jax.jit,
                   static_argnames=("tm", "th", "resident", "vmem_limit", "out_dtype"))
def _ffn_impl(x2, w1, b1, w2, b2, *, tm, th, resident, vmem_limit, out_dtype):
    M, dim = x2.shape
    hidden = w1.shape[0]

    # bf16 MXU operands with f32 accumulation — cast once here (wrapper side), not per
    # grid step inside the kernel.  (Explicitly not bit-accurate vs f32 reference.)
    x2 = x2.astype(jnp.bfloat16)
    w1 = w1.astype(jnp.bfloat16)
    w2 = w2.astype(jnp.bfloat16)
    b1 = b1.astype(jnp.float32)
    b2 = b2.astype(jnp.float32)

    M_pad = _round_up(M, tm)
    if M_pad != M:
        x2 = jnp.pad(x2, ((0, M_pad - M), (0, 0)))
    b2_2d = b2.reshape(1, dim)

    if resident:
        b1_2d = b1.reshape(1, hidden)
        grid = (M_pad // tm,)
        out = pl.pallas_call(
            _ffn_resident_kernel,
            out_shape=jax.ShapeDtypeStruct((M_pad, dim), out_dtype),
            grid_spec=pltpu.PrefetchScalarGridSpec(
                num_scalar_prefetch=0,
                grid=grid,
                in_specs=[
                    pl.BlockSpec((tm, dim), lambda i: (i, 0)),        # x rows (streamed)
                    pl.BlockSpec((hidden, dim), lambda i: (0, 0)),    # W1 resident
                    pl.BlockSpec((1, hidden), lambda i: (0, 0)),      # b1 resident
                    pl.BlockSpec((dim, hidden), lambda i: (0, 0)),    # W2 resident
                    pl.BlockSpec((1, dim), lambda i: (0, 0)),         # b2 resident
                ],
                out_specs=pl.BlockSpec((tm, dim), lambda i: (i, 0)),
            ),
            compiler_params=pltpu.CompilerParams(
                dimension_semantics=("parallel",),
                vmem_limit_bytes=int(vmem_limit),
            ),
        )(x2, w1, b1_2d, w2, b2_2d)
    else:
        H_pad = _round_up(hidden, th)
        if H_pad != hidden:
            # Zero padding is exact: GELU(0)=0 and zero W2 columns contribute nothing.
            w1 = jnp.pad(w1, ((0, H_pad - hidden), (0, 0)))
            b1 = jnp.pad(b1, ((0, H_pad - hidden),))
            w2 = jnp.pad(w2, ((0, 0), (0, H_pad - hidden)))
        b1_2d = b1.reshape(1, H_pad)
        grid = (M_pad // tm, H_pad // th)                 # (rows: parallel, hidden: reduce)
        kernel = functools.partial(_ffn_reduction_kernel, th=th)
        out = pl.pallas_call(
            kernel,
            out_shape=jax.ShapeDtypeStruct((M_pad, dim), out_dtype),
            grid_spec=pltpu.PrefetchScalarGridSpec(
                num_scalar_prefetch=0,
                grid=grid,
                in_specs=[
                    pl.BlockSpec((tm, dim), lambda i, h: (i, 0)),     # x rows
                    pl.BlockSpec((th, dim), lambda i, h: (h, 0)),     # W1 slice (native)
                    pl.BlockSpec((1, H_pad), lambda i, h: (0, 0)),    # b1 resident (full)
                    pl.BlockSpec((dim, th), lambda i, h: (0, h)),     # W2 slice (native)
                    pl.BlockSpec((1, dim), lambda i, h: (0, 0)),      # b2 resident
                ],
                out_specs=pl.BlockSpec((tm, dim), lambda i, h: (i, 0)),
                scratch_shapes=[pltpu.VMEM((tm, dim), jnp.float32)],  # f32 accumulator
            ),
            compiler_params=pltpu.CompilerParams(
                dimension_semantics=("parallel", "arbitrary"),
                vmem_limit_bytes=int(vmem_limit),
            ),
        )(x2, w1, b1_2d, w2, b2_2d)

    if M_pad != M:
        out = out[:M]
    return out


def feed_forward(x, w1, b1, w2, b2):
    """x: (..., dim). w1: (hidden, dim), b1: (hidden,), w2: (dim, hidden), b2: (dim,)."""
    orig_shape = x.shape
    dim = orig_shape[-1]
    hidden = w1.shape[0]
    x2 = x.reshape(-1, dim)
    M = x2.shape[0]
    out_dtype = x.dtype
    out_bytes = jnp.dtype(out_dtype).itemsize

    budget = _vmem_budget_bytes()

    # ---- resident decision: can both bf16 weight matrices + biases live in VMEM? ----
    weight_bytes = 2 * hidden * dim * 2 + (hidden + dim) * 4
    # Per-output-row bytes: double-buffered x/out tiles + f32 intermediate/epilogue.
    per_row = dim * 2 * 2 + dim * out_bytes * 2 + hidden * 4 + dim * 4
    resident = weight_bytes <= budget // 3

    if resident:
        tm = min(1024, _round_up(M, 8))
        while tm > 8 and weight_bytes + tm * per_row > budget:
            tm = max(8, _round_up(tm // 2, 8))
        # Prefer >=2 row tiles so the parallel axis can split across v7x's 2 TensorCores
        # (weights are resident, so extra row tiles cost no extra HBM traffic).
        if M > 8 and _round_up(M, tm) // tm < 2:
            tm = max(8, _round_up((M + 1) // 2, 8))
        th = hidden
    else:
        # Streaming path: weights are re-streamed once per row tile, so size tm from the
        # per-generation VMEM budget (arithmetic intensity ~ tm bf16-FLOP/byte).
        if budget >= 90 * 1024 * 1024:      # v5e / v6e class (128 MiB physical VMEM)
            tm = 768
        elif budget >= 40 * 1024 * 1024:    # v7x class (64 MiB physical VMEM)
            tm = 512
        else:
            tm = 256
        tm = min(tm, _round_up(M, 8))
        th = min(512, _round_up(hidden, 128))
        h_pad = _round_up(hidden, th)

        def _est(tm_):
            return (tm_ * dim * 2 * 2            # x tiles (double-buffered, bf16)
                    + tm_ * dim * out_bytes * 2  # out tiles (double-buffered)
                    + th * dim * 2 * 2           # W1 tiles (double-buffered, bf16)
                    + dim * th * 2 * 2           # W2 tiles (double-buffered, bf16)
                    + tm_ * dim * 4              # f32 accumulator
                    + tm_ * th * 4               # f32 intermediate
                    + (h_pad + dim) * 4)         # resident biases

        while tm > 8 and _est(tm) > budget:
            tm = max(8, _round_up(tm // 2, 8))

    out = _ffn_impl(x2, w1, b1, w2, b2, tm=tm, th=th, resident=resident,
                    vmem_limit=budget, out_dtype=out_dtype)
    return out.reshape(orig_shape)


def _reference(x, w1, b1, w2, b2):
    h = x @ w1.T + b1
    h = jax.nn.gelu(h, approximate=False)
    return h @ w2.T + b2


if __name__ == "__main__":
    # Shapes implied by the module: tokens (batch, seq, dim), hidden_dim for the MLP.
    batch, seq, dim, hidden_dim = 2, 8, 32, 64

    key = jax.random.PRNGKey(0)
    kx, kw1, kb1, kw2, kb2 = jax.random.split(key, 5)

    x = jax.random.normal(kx, (batch, seq, dim), dtype=jnp.float32)
    # Deterministic parameter init (torch.nn.Linear-style uniform bounds).
    bound1 = 1.0 / (dim ** 0.5)
    bound2 = 1.0 / (hidden_dim ** 0.5)
    w1 = jax.random.uniform(kw1, (hidden_dim, dim), jnp.float32, -bound1, bound1)
    b1 = jax.random.uniform(kb1, (hidden_dim,), jnp.float32, -bound1, bound1)
    w2 = jax.random.uniform(kw2, (dim, hidden_dim), jnp.float32, -bound2, bound2)
    b2 = jax.random.uniform(kb2, (dim,), jnp.float32, -bound2, bound2)

    ref = _reference(x, w1, b1, w2, b2)

    # Main entry point (will take the resident-weight path at these shapes).
    out = jax.block_until_ready(feed_forward(x, w1, b1, w2, b2))
    assert out.shape == (batch, seq, dim)
    # bf16 MXU operands (f32 accumulation) => loose tolerance vs pure-f32 reference.
    assert jnp.allclose(out, ref, atol=2e-2, rtol=2e-2), "resident path mismatch"

    # Also exercise the streaming (hidden-reduction) path so both kernels are validated.
    out2 = jax.block_until_ready(
        _ffn_impl(x.reshape(-1, dim), w1, b1, w2, b2,
                  tm=8, th=128, resident=False,
                  vmem_limit=_vmem_budget_bytes(), out_dtype=x.dtype)
    ).reshape(batch, seq, dim)
    assert jnp.allclose(out2, ref, atol=2e-2, rtol=2e-2), "streaming path mismatch"

    print("KERNEL_OK")
</pallas_src>

<mosaic_0001>
module attributes {stable_mosaic.version = 11 : i64} {
  func.func @_ffn_resident_kernel(%arg0: i32, %arg1: memref<8x32xbf16, #tpu.memory_space<vmem>>, %arg2: memref<64x32xbf16, #tpu.memory_space<vmem>>, %arg3: memref<1x64xf32, #tpu.memory_space<vmem>>, %arg4: memref<32x64xbf16, #tpu.memory_space<vmem>>, %arg5: memref<1x32xf32, #tpu.memory_space<vmem>>, %arg6: memref<8x32xf32, #tpu.memory_space<vmem>>) attributes {dimension_semantics = [#tpu.dimension_semantics<parallel>], iteration_bounds = array<i64: 2>, scalar_prefetch = 0 : i64, scratch_operands = 0 : i64, tpu.core_type = #tpu.core_type<tc>, window_params = [{transform_indices = @transform_0, window_bounds = array<i64: 8, 32>}, {pipeline_mode = #tpu.pipeline_mode<synchronous>, transform_indices = @transform_1, window_bounds = array<i64: 64, 32>}, {pipeline_mode = #tpu.pipeline_mode<synchronous>, transform_indices = @transform_2, window_bounds = array<i64: 1, 64>}, {pipeline_mode = #tpu.pipeline_mode<synchronous>, transform_indices = @transform_3, window_bounds = array<i64: 32, 64>}, {pipeline_mode = #tpu.pipeline_mode<synchronous>, transform_indices = @transform_4, window_bounds = array<i64: 1, 32>}, {transform_indices = @transform_5, window_bounds = array<i64: 8, 32>}]} {
    %c0 = arith.constant 0 : index
    %c0_0 = arith.constant 0 : index
    %0 = vector.load %arg1[%c0, %c0_0] : memref<8x32xbf16, #tpu.memory_space<vmem>>, vector<8x32xbf16>
    %c0_1 = arith.constant 0 : index
    %c0_2 = arith.constant 0 : index
    %1 = vector.load %arg2[%c0_1, %c0_2] : memref<64x32xbf16, #tpu.memory_space<vmem>>, vector<64x32xbf16>
    %cst = arith.constant dense<0.000000e+00> : vector<8x64xf32>
    %2 = tpu.matmul %0, %1, %cst {dimension_numbers = #tpu.dot_dimension_numbers<[1], [1], [0], [0], [0, 0, 1, 0], [], []>} : vector<8x32xbf16>, vector<64x32xbf16>, vector<8x64xf32> -> vector<8x64xf32>
    %c0_3 = arith.constant 0 : index
    %c0_4 = arith.constant 0 : index
    %3 = vector.load %arg3[%c0_3, %c0_4] : memref<1x64xf32, #tpu.memory_space<vmem>>, vector<1x64xf32>
    %4 = vector.broadcast %3 : vector<1x64xf32> to vector<8x64xf32>
    %5 = arith.addf %2, %4 : vector<8x64xf32>
    %cst_5 = arith.constant 5.000000e-01 : f32
    %6 = vector.broadcast %cst_5 : f32 to vector<8x64xf32>
    %7 = arith.mulf %6, %5 : vector<8x64xf32>
    %cst_6 = arith.constant 0.707106769 : f32
    %8 = vector.broadcast %cst_6 : f32 to vector<8x64xf32>
    %9 = arith.mulf %5, %8 : vector<8x64xf32>
    %10 = math.erf %9 : vector<8x64xf32>
    %cst_7 = arith.constant 1.000000e+00 : f32
    %11 = vector.broadcast %cst_7 : f32 to vector<8x64xf32>
    %12 = arith.addf %11, %10 : vector<8x64xf32>
    %13 = arith.mulf %7, %12 : vector<8x64xf32>
    %14 = arith.truncf %13 : vector<8x64xf32> to vector<8x64xbf16>
    %c0_8 = arith.constant 0 : index
    %c0_9 = arith.constant 0 : index
    %15 = vector.load %arg4[%c0_8, %c0_9] : memref<32x64xbf16, #tpu.memory_space<vmem>>, vector<32x64xbf16>
    %cst_10 = arith.constant dense<0.000000e+00> : vector<8x32xf32>
    %16 = tpu.matmul %14, %15, %cst_10 {dimension_numbers = #tpu.dot_dimension_numbers<[1], [1], [0], [0], [0, 0, 1, 0], [], []>} : vector<8x64xbf16>, vector<32x64xbf16>, vector<8x32xf32> -> vector<8x32xf32>
    %c0_11 = arith.constant 0 : index
    %c0_12 = arith.constant 0 : index
    %17 = vector.load %arg5[%c0_11, %c0_12] : memref<1x32xf32, #tpu.memory_space<vmem>>, vector<1x32xf32>
    %18 = vector.broadcast %17 : vector<1x32xf32> to vector<8x32xf32>
    %19 = arith.addf %16, %18 : vector<8x32xf32>
    %c0_13 = arith.constant 0 : index
    %c0_14 = arith.constant 0 : index
    %20 = vector.load %arg6[%c0_13, %c0_14] : memref<8x32xf32, #tpu.memory_space<vmem>>, vector<8x32xf32>
    tpu.vector_store %arg6[%c0_13, %c0_14], %19 {strides = array<i32>} : memref<8x32xf32, #tpu.memory_space<vmem>>, vector<8x32xf32>,
    return
  }
  func.func @transform_0(%arg0: i32) -> (i32, i32) {
    %c0_i32 = arith.constant 0 : i32
    %c0_i32_0 = arith.constant 0 : i32
    return %arg0, %c0_i32 : i32, i32
  }
  func.func @transform_1(%arg0: i32) -> (i32, i32) {
    %c0_i32 = arith.constant 0 : i32
    %c0_i32_0 = arith.constant 0 : i32
    %c0_i32_1 = arith.constant 0 : i32
    return %c0_i32, %c0_i32_0 : i32, i32
  }
  func.func @transform_2(%arg0: i32) -> (i32, i32) {
    %c0_i32 = arith.constant 0 : i32
    %c0_i32_0 = arith.constant 0 : i32
    %c0_i32_1 = arith.constant 0 : i32
    return %c0_i32, %c0_i32_0 : i32, i32
  }
  func.func @transform_3(%arg0: i32) -> (i32, i32) {
    %c0_i32 = arith.constant 0 : i32
    %c0_i32_0 = arith.constant 0 : i32
    %c0_i32_1 = arith.constant 0 : i32
    return %c0_i32, %c0_i32_0 : i32, i32
  }
  func.func @transform_4(%arg0: i32) -> (i32, i32) {
    %c0_i32 = arith.constant 0 : i32
    %c0_i32_0 = arith.constant 0 : i32
    %c0_i32_1 = arith.constant 0 : i32
    return %c0_i32, %c0_i32_0 : i32, i32
  }
  func.func @transform_5(%arg0: i32) -> (i32, i32) {
    %c0_i32 = arith.constant 0 : i32
    %c0_i32_0 = arith.constant 0 : i32
    return %arg0, %c0_i32 : i32, i32
  }
}

</mosaic_0001>

<bundles_post_ra>
// kernel: _ffn_impl.1
= control target key start
LH: loop header
LB: loop body
LE: loop exit
PB: predicated region body
PF: predicated region fallthrough
CT: control target
= control target key end

     0   :  { %10 = vsyncpa [#allocation3], 0  ;;  %s788_s0 = inlined_call_operand.vmem [shape: bf16[16,32], index: 0, kind: input, shape index: {}]   ;;  %s789_s1 = inlined_call_operand.vmem [shape: bf16[64,32], index: 1, kind: input, shape index: {}]   ;;  %s790_s2 = inlined_call_operand.vmem [shape: f32[1,64], index: 2, kind: input, shape index: {}]   ;;  %s791_s3 = inlined_call_operand.vmem [shape: bf16[32,64], index: 3, kind: input, shape index: {}]   ;;  %s792_s4 = inlined_call_operand.vmem [shape: f32[1,32], index: 4, kind: input, shape index: {}]   ;;  %s793_s5 = inlined_call_operand.hbm [shape: f32[16,32], index: 5, kind: output, shape index: {}]  }
   0x1   :  { %12 = vsyncpa [#allocation3 + $0x1], 0  ;;  %s656_s18 = smov 0   ;;  %s658_s19 = smov 0  }
   0x2   :  { %s660_s20 = smov 0   ;;  %s662_s21 = smov 0  }
   0x3 LB: > { %s677_s22 = sadd.s32 4294967295, %s621_s21   ;;  %s464_s23 = sadd.s32 4294967294, %s621_s21   ;;  %s621_s21 = sphi %s662_s21, %s799_s21   ;;  %s617_s20 = sphi %s660_s20, %s798_s20   ;;  %s613_s19 = sphi %s658_s19, %s797_s19   ;;  %s609_s18 = sphi %s656_s18, %s796_s18  }
   0x4   : > { %s681_s24 = sadd.s32 1, %s621_s21   ;;  %s135_s25 = sadd.s32 1, %s617_s20 }
   0x5   : > { %s132_s26 = ssub.s32 %s621_s21, %s681_s24  ;;  %p145_p0 = scmp.ne.s32.totalorder %s617_s20, %s613_s19 }
   0x6   : > { %p133_p1 = scmp.eq.s32.totalorder %s132_s26, 0  ;;  %p146_p2 = scmp.eq.s32.totalorder %s677_s22, 1 }
   0x7   : > { %p151_p3 = scmp.ne.s32.totalorder %s613_s19, %s609_s18  ;;  %p152_p4 = scmp.eq.s32.totalorder %s464_s23, 1 }
   0x8   : > { %s692_s27 = scalar_select %p133_p1, %s617_s20, %s135_s25  }
   0x9   : > { %p694_p5 = por %p146_p2, %p145_p0  ;;  %p698_p6 = por %p152_p4, %p151_p3 }
   0xa   : > { %p467_p7 = scmp.ge.s32.totalorder %s621_s21, 1  ;;  %p189_p8 = scmp.lt.s32.totalorder %s621_s21, 3 }
   0xc   : > { %p190_p9 = pnand %p467_p7, %p189_p8 }
   0xd   : > { %p216_p10 = scmp.lt.s32.totalorder (!%p190_p9), %s677_s22, 1  ;;  %s213_s8 = sand.u32 (!%p190_p9), 1, %s613_s19  }
   0xe   : > { %193 = sbr.rel (%p190_p9) target bundleno = 478 (0x1de), region = 40  ;;  %s468_s9 = sshll.u32 (!%p190_p9), %s213_s8, 3 }
   0xf   : > { %s481_s12 = sshll.u32 (!%p190_p9), %s677_s22, 7  ;;  %s392_s23 = scalar_lea.sflag (!%p190_p9), [#allocation3], %s213_s8 }
  0x10   : > { %s625_s25 = smov (!%p190_p9), [#allocation2]  }
  0x11   : > { %s565_s26 = sshll.u32 (!%p190_p9), %s625_s25, 4  ;;  %s566_s26 = int_to_ptr.vmem [resolvable:$false] %s565_s26 }
  0x12   : > { %s567_s30 = scalar_lea.vmem (!%p190_p9), %s566_s26, 256 }
  0x13   : > { %v553_v0 = vld [vmem:[%s789_s1 + $0x18] sm:$0xff]   ;;  %v623_v1 = vmov 0.0   ;;  %vm257_vm0 = vcmask 261120   ;;  %v554_v3 = vld [vmem:[%s789_s1 + $0x10] sm:$0xff]   ;;  %vm624_vm1 = vmmov 0   ;;  %v555_v5 = vld [vmem:[%s789_s1 + $0x8] sm:$0xff]  }
  0x14   : > { %492 = vmatprep.subr.bf16.mxu0 %v623_v1  ;;  %504 = vmatprep.subr.bf16.mxu1 %v623_v1  ;;  %v271_v2 = vsel %vm257_vm0, %v553_v0, 0  ;;  %v268_v4 = vsel %vm257_vm0, %v554_v3, 0  ;;  %v265_v6 = vsel %vm257_vm0, %v555_v5, 0  ;;  %v556_v7 = vld [vmem:[%s789_s1] sm:$0xff]   ;;  %s217_s13 = scalar_select %p216_p10, %s677_s22, 1  ;;  %v557_v10 = vld [vmem:[%s791_s3 + $0x8] sm:$0xff]  }
  0x15   : > { %493 = vmatpush3.bf16.xpose.msra.mxu0 %v271_v2  ;;  %500 = vmatprep.mubr.msk.bf16.mxu0 %vm624_vm1, %v623_v1  ;;  %v262_v8 = vsel %vm257_vm0, %v556_v7, 0  ;;  %vm340_vm2 = vcmask 523264   ;;  %v558_v12 = vld [vmem:[%s791_s3] sm:$0xff]  }
  0x16   : > { %494 = vmatprep.subr.bf16.mxu0 %v623_v1  ;;  %508 = vmatprep.mubr.msk.bf16.mxu1 %vm624_vm1, %v623_v1  ;;  %s469_s14 = sshll.u32 %s217_s13, 2  ;;  %v348_v11 = vsel %vm340_vm2, %v557_v10, 0  ;;  %v345_v13 = vsel %vm340_vm2, %v558_v12, 0  ;;  %v470_v14 = vld [vmem:[%s790_s2] ss:$0 sm:$0xff]  ;;  %s215_s13 = scalar_lea.vmem [#allocation2], %s468_s9 }
  0x17   : > { %s219_s17 = scalar_lea.vmem %s788_s0, %s469_s14  ;;  %505 = vmatpush3.bf16.xpose.msra.mxu1 %v348_v11  ;;  %v476_v26 = vld [vmem:[%s792_s4] ss:$0 sm:$0xff]  ;;  %s405_s14 = sshll.u32 %s215_s13, 4  ;;  %s748_s14 = int_to_ptr.vmem [resolvable:$true] %s405_s14 }
  0x18   : > { %v221_v9 = vld [vmem:[%s219_s17] sm:$0xf]  ;;  %506 = vmatprep.subr.bf16.mxu1 %v623_v1  ;;  %s746_s17 = scalar_lea.hbm %s793_s5, %s481_s12  ;;  %s561_s22 = scalar_lea.vmem %s748_s14, 128 }
  0x19   : > { %p562_p11 = scmp.ne.s32.totalorder %s748_s14, %s561_s22  ;;  %p568_p0 = scmp.lt.s32.totalorder %s748_s14, %s566_s26 }
  0x1a   : > { %p569_p1 = scmp.lt.s32.totalorder %s567_s30, %s561_s22 }
  0x1b   : > { %p563_p12 = pnand %p562_p11, %p694_p5 }
  0x1c   : > { %p570_p2 = por %p569_p1, %p568_p0 }
  0x1d   : > { %495 = vmatpush3.bf16.xpose.msra.mxu0 %v268_v4  ;;  %p564_p13 = pneg %p563_p12 }
  0x1e   : > { %496 = vmatprep.subr.bf16.mxu0 %v623_v1 }
  0x1f   : > { %507 = vmatpush3.bf16.xpose.msra.mxu1 %v345_v13  ;;  %p571_p3 = pnand %p570_p2, %p564_p13 }
  0x25   : > { %497 = vmatpush3.bf16.xpose.msra.mxu0 %v265_v6 }
  0x26   : > { %498 = vmatprep.subr.bf16.mxu0 %v623_v1 }
  0x2d   : > { %499 = vmatpush3.bf16.xpose.msra.mxu0 %v262_v8 }
  0x34   : > { %501 = vmatmul.mubr.msk.bf16.vlgmr.msra.gmra.mxu0 %vm257_vm0, %v221_v9 }
  0xf4   : > { %v307_v15 = vpop.f32.mrf.mxu0 }
  0xf5   : > { %v308_v16 = vadd.f32 %v470_v14, %v307_v15 }
  0xf6   : > { %v502_v17 = vpop.f32.mrf.mxu0 }
  0xf7   : > { %v314_v18 = vmul.f32 0.70710677, %v308_v16  ;;  %v313_v22 = vmul.f32 0.5, %v308_v16 }
  0xf8   : > { %v310_v19 = vpop.f32.mrf.mxu0 }
  0xf9   : > { %559 = verf.f32 %v314_v18 }
  0xfa   : > { %v503_v20 = vpop.f32.mrf.mxu0 }
 0x106   : > { %v560_v21 = vpop.eup %559 }
 0x107   : > { %v316_v23 = vadd.f32 1.0, %v560_v21 }
 0x109   : > { %v317_v24 = vmul.f32 %v316_v23, %v313_v22 }
 0x10b   : > { %v318_v25 = vpack.c.bf16 %v317_v24, %v317_v24 }
 0x10d   : > { %509 = vmatmul.mubr.msk.bf16.vlgmr.msra.gmra.mxu1 %vm340_vm2, %v318_v25 }
 0x1cd   : > { %v384_v27 = vpop.f32.mrf.mxu1 }
 0x1ce   : > { %v385_v28 = vadd.f32 %v476_v26, %v384_v27 }
 0x1cf   : > { %v510_v29 = vpop.f32.mrf.mxu1 }
 0x1d0   : > { %390 = vst.msk [vmem:[%s215_s13] sm:$0xff] %vm257_vm0, %v385_v28 }
 0x1d1   : > { %v387_v30 = vpop.f32.mrf.mxu1 }
 0x1d2   : > { %574 = shalt.err (!%p571_p3)
}
 0x1d3   : > { %s575_s6 = scalar_lea.hbm %s746_s17, 128  ;;  %s579_s9 = scalar_lea.hbm %s793_s5, 256 }
 0x1d4   : > { %p576_p4 = scmp.ne.s32.totalorder %s746_s17, %s575_s6  ;;  %p580_p9 = scmp.lt.s32.totalorder %s746_s17, %s793_s5 }
 0x1d5   : > { %p581_p10 = scmp.lt.s32.totalorder %s579_s9, %s575_s6 }
 0x1d6   : > { %p577_p7 = pnand %p576_p4, %p694_p5 }
 0x1d7   : > { %p582_p11 = por %p581_p10, %p580_p9 }
 0x1d8   : > { %p578_p8 = pneg %p577_p7 }
 0x1da   : > { %p583_p12 = pnand %p582_p11, %p578_p8 }
 0x1dc   : > { %586 = shalt.err (!%p583_p12)
}
 0x1dd   : > { %512 = dma.vmem_to_hbm [thread:$0]  (%p694_p5), %s748_s14, 128, %s746_s17, %s392_s23   ;;  %v511_v31 = vpop.f32.mrf.mxu1 }
 0x1de PF: > { %p518_p13 = scmp.ge.s32.totalorder %s621_s21, 2  ;;  %s417_s12 = sand.u32 1, %s609_s18  }
 0x1df   : > { %s418_s13 = scalar_lea.sflag [#allocation3], %s417_s12 }
 0x1e0   : > { %p515_p0 = pnand %p518_p13, %p698_p6 }
 0x1e2   : > { %p516_p1 = pneg %p515_p0 }
 0x1e4   : > { %604 = dma.done.wait (%p516_p1), %s418_s13, 128  }
 0x1e5   : > { %606 = vsyncadd (%p516_p1), %s418_s13, 4294967168  ;;  %p15_p2 = scmp.ge.s32.totalorder %s681_s24, 4   ;;  %s796_s18 = smov %s613_s19 }
 0x1e6   : > { %s797_s19 = smov %s617_s20  ;;  %s798_s20 = smov %s692_s27 }
 0x1e7   : > { %s799_s21 = smov %s681_s24  ;;  %17 = sbr.rel (!%p15_p2) target bundleno = 3 (0x3), region = 75 }
 0x1ec   :  { %423 = vsyncpa [#allocation3], 1 }
 0x1ed   :  { %425 = vsyncpa [#allocation3 + $0x1], 1 }

</bundles_post_ra>
